<compile_context>
chip_gen: v7x
topology: tpu7x:2x2x1
jax: 0.10.0
libtpu: 0.0.40
codegen_flags: <defaults>
</compile_context>

<pallas_src>
import numpy as np
import jax
import jax.numpy as jnp
from jax.experimental import pallas as pl
from jax.experimental.pallas import tpu as pltpu

# ----------------------------- configuration -------------------------------
B, C, H, W = 2, 4, 16, 16          # small NCHW input
HW = H * W                         # 256 pixels in lanes
BC = B * C                         # 8  sublane-packed batch*channel rows
HID = 32                           # hidden width of the eps-prediction MLP
BH = B * HID                       # 64
NUM_CLASSES = 8
BN = B * NUM_CLASSES               # 16
T_DIFFUSION = 10                   # length of the diffusion schedule
T_SDEDIT = 3                       # self.t  (DDIM loop runs 4 steps: 3,2,1,0)

# Deterministic diffusion schedule, baked as Python constants.
_betas = np.linspace(1e-4, 0.02, T_DIFFUSION, dtype=np.float64)
_acp = np.cumprod(1.0 - _betas)    # alphas_cumprod


def _sq(v):
    return float(np.sqrt(v))


# ---- packed parameter buffer: row offsets (single DMA for all weights) ----
BIAS_OFF = 0                                   # (T+1)*BH rows, lane-dense (b1+temb)
W1_OFF = BIAS_OFF + (T_SDEDIT + 1) * BH        # 256   (64 rows,  cols 0:8  used)
W2_OFF = W1_OFF + BH                           # 320   (8 rows,   cols 0:64 used)
B2_OFF = W2_OFF + BC                           # 328   (8 rows,   lane-dense b2)
WCLS_OFF = B2_OFF + BC                         # 336   (16 rows,  cols 0:8  used)
BC_OFF = WCLS_OFF + BN                         # 352   (16 rows,  col 0 used)
P_ROWS = BC_OFF + BN                           # 368   (multiple of 8)


# ------------------------------- the kernel --------------------------------
def sdedit_classifier_kernel(x_ref, mask_ref, noise_ref, p_ref, logits_ref):
    # x/mask : (BC, HW)     noise : (T+1, BC, HW)     p : (P_ROWS, HW)
    # logits : (BN, 1)  (row = b*NUM_CLASSES + n, reshaped to (B, NUM_CLASSES) outside)
    w1blk = p_ref[W1_OFF:W1_OFF + BH, 0:BC]         # (64, 8)  block-diag W1^T
    w2blk = p_ref[W2_OFF:W2_OFF + BC, 0:BH]         # (8, 64)  block-diag W2^T
    b2d = p_ref[B2_OFF:B2_OFF + BC, :]              # (8, 256) lane-dense b2
    wcls = p_ref[WCLS_OFF:WCLS_OFF + BN, 0:BC]      # (16, 8)  block-diag 0.5/HW * wc^T
    bcls = p_ref[BC_OFF:BC_OFF + BN, 0:1]           # (16, 1)  bc + 0.5*sum_c wc

    t = T_SDEDIT

    # sdedit: x = x * 2 - 1  (batch packed into sublanes, pixels in lanes)
    xb = x_ref[...] * 2.0 - 1.0                     # (8, 256)
    m_bool = mask_ref[...] != 0.0                   # binary region mask -> blend == select

    # x_t = q_sample(x, t)
    sample = _sq(_acp[t]) * xb + _sq(1.0 - _acp[t]) * noise_ref[0]

    for i in range(t, -1, -1):                      # indices = list(range(t+1))[::-1]
        # ---- model(sample, i): block-diagonal per-pixel channel MLP (MXU) ----
        bias_i = p_ref[BIAS_OFF + i * BH:BIAS_OFF + (i + 1) * BH, :]   # (64, 256) dense
        h = jnp.tanh(
            jnp.dot(w1blk, sample, preferred_element_type=jnp.float32) + bias_i)
        eps = jnp.dot(w2blk, h, preferred_element_type=jnp.float32) + b2d   # (8, 256)

        # ---- ddim_sample (eta = 0, clip_denoised=True), scalars folded ----
        sr = _sq(1.0 / _acp[i])                     # sqrt(1/alpha_bar_t)
        srm1 = _sq(1.0 / _acp[i] - 1.0)             # sqrt(1/alpha_bar_t - 1)
        acp_prev = _acp[i - 1] if i > 0 else 1.0
        c1 = _sq(acp_prev) - _sq(1.0 - acp_prev) / srm1
        c2 = _sq(1.0 - acp_prev) * sr / srm1
        pred_xstart = jnp.clip(sr * sample - srm1 * eps, -1.0, 1.0)
        ddim = c1 * pred_xstart + c2 * sample

        # ---- region re-noising: select(mask, ddim, q_sample(x, i-1)) ----
        if i > 0:
            k = t - i + 1                           # in-loop noise draw index
            qs = (_sq(_acp[i - 1]) * xb
                  + _sq(1.0 - _acp[i - 1]) * noise_ref[k])
            sample = jnp.where(m_bool, ddim, qs)
        else:
            sample = jnp.where(m_bool, ddim, xb)

    # ---- classifier: to_01 + spatial mean-pool + linear head, folded into
    #      one block-diag matmul (wcls already carries the 0.5/HW scale) plus a
    #      lane reduce (XLU) and a single full-ref store.
    logits_ref[...] = (
        jnp.sum(jnp.dot(wcls, sample, preferred_element_type=jnp.float32),
                axis=-1, keepdims=True)
        + bcls)


# ------------------------------- parameters --------------------------------
def make_params():
    rng = np.random.RandomState(42)
    temb = np.zeros((T_SDEDIT + 1, HID), np.float32)
    for i in range(T_SDEDIT + 1):
        for j in range(HID):
            temb[i, j] = np.sin(i / (10000.0 ** (j / HID)))
    w1 = rng.normal(0.0, 0.1, (C, HID)).astype(np.float32)
    b1 = np.zeros((1, HID), np.float32)
    w2 = rng.normal(0.0, 0.1, (HID, C)).astype(np.float32)
    b2 = np.zeros((1, C), np.float32)
    wc = rng.normal(0.0, 0.1, (C, NUM_CLASSES)).astype(np.float32)
    bc = np.zeros((1, NUM_CLASSES), np.float32)

    p = np.zeros((P_ROWS, HW), np.float32)

    # time-embedding bias (b1 + temb), batch-tiled to (T+1, B*HID), lane-dense.
    per_step = temb + b1                                         # (T+1, HID)
    blk = np.tile(per_step, (1, B))                              # (T+1, B*HID)
    p[BIAS_OFF:BIAS_OFF + (T_SDEDIT + 1) * BH, :] = np.broadcast_to(
        blk[:, :, None], (T_SDEDIT + 1, BH, HW)).reshape(-1, HW)

    # block-diagonal MLP / classifier weights (one matmul covers both batch blocks).
    for b in range(B):
        p[W1_OFF + b * HID:W1_OFF + (b + 1) * HID, b * C:(b + 1) * C] = w1.T
        p[W2_OFF + b * C:W2_OFF + (b + 1) * C, b * HID:(b + 1) * HID] = w2.T
        p[WCLS_OFF + b * NUM_CLASSES:WCLS_OFF + (b + 1) * NUM_CLASSES,
          b * C:(b + 1) * C] = wc.T * (0.5 / HW)                 # to_01 + mean folded
        p[BC_OFF + b * NUM_CLASSES:BC_OFF + (b + 1) * NUM_CLASSES, 0] = (
            bc[0] + 0.5 * wc.sum(axis=0))

    # lane-dense b2 (batch-tiled)
    p[B2_OFF:B2_OFF + BC, :] = np.broadcast_to(
        np.tile(b2[0], B)[:, None], (BC, HW))

    return jnp.asarray(p)


# ------------------------------- the wrapper --------------------------------
@jax.jit
def region_denoised_classifier(x_nchw, mask_nchw, noise_nchw, params):
    # Zero-copy contiguous reshapes: NCHW -> (B*C, H*W); noise -> (T+1, B*C, H*W)
    x_r = x_nchw.reshape(BC, HW)
    m_r = mask_nchw.reshape(BC, HW)
    n_r = noise_nchw.reshape(T_SDEDIT + 1, BC, HW)

    vmem = lambda: pl.BlockSpec(memory_space=pltpu.MemorySpace.VMEM)
    logits_flat = pl.pallas_call(
        sdedit_classifier_kernel,
        out_shape=jax.ShapeDtypeStruct((BN, 1), jnp.float32),
        in_specs=[vmem() for _ in range(4)],
        out_specs=vmem(),
    )(x_r, m_r, n_r, params)
    return logits_flat.reshape(B, NUM_CLASSES)


# ---------------------------------- main ------------------------------------
if __name__ == "__main__":
    key = jax.random.PRNGKey(0)
    kx, kn = jax.random.split(key)

    # input image batch in [0, 1], NCHW (PyTorch convention)
    x = jax.random.uniform(kx, (B, C, H, W), dtype=jnp.float32)

    # region mask: 1 inside a centered 8x8 square, 0 outside (broadcast over B, C)
    m2d = np.zeros((H, W), np.float32)
    m2d[4:12, 4:12] = 1.0
    mask = jnp.broadcast_to(jnp.asarray(m2d)[None, None], (B, C, H, W))

    # Gaussian noise used by q_sample: 1 for the initial x_t + T_SDEDIT in-loop draws
    noise = jax.random.normal(kn, (T_SDEDIT + 1, B, C, H, W), dtype=jnp.float32)

    params = make_params()
    logits = region_denoised_classifier(x, mask, noise, params)
    jax.block_until_ready(logits)
    assert logits.shape == (B, NUM_CLASSES)
    print("KERNEL_OK")
</pallas_src>

<mosaic_0001>
module attributes {stable_mosaic.version = 11 : i64} {
  func.func @sdedit_classifier_kernel(%arg0: memref<8x256xf32, #tpu.memory_space<vmem>>, %arg1: memref<8x256xf32, #tpu.memory_space<vmem>>, %arg2: memref<4x8x256xf32, #tpu.memory_space<vmem>>, %arg3: memref<368x256xf32, #tpu.memory_space<vmem>>, %arg4: memref<16x1xf32, #tpu.memory_space<vmem>>) attributes {dimension_semantics = [], scalar_prefetch = 0 : i64, scratch_operands = 0 : i64, tpu.core_type = #tpu.core_type<tc>} {
    %c256 = arith.constant 256 : index
    %c0 = arith.constant 0 : index
    %0 = vector.load %arg3[%c256, %c0] : memref<368x256xf32, #tpu.memory_space<vmem>>, vector<64x8xf32>
    %c320 = arith.constant 320 : index
    %c0_0 = arith.constant 0 : index
    %1 = vector.load %arg3[%c320, %c0_0] : memref<368x256xf32, #tpu.memory_space<vmem>>, vector<8x64xf32>
    %c328 = arith.constant 328 : index
    %c0_1 = arith.constant 0 : index
    %2 = vector.load %arg3[%c328, %c0_1] : memref<368x256xf32, #tpu.memory_space<vmem>>, vector<8x256xf32>
    %c336 = arith.constant 336 : index
    %c0_2 = arith.constant 0 : index
    %3 = vector.load %arg3[%c336, %c0_2] : memref<368x256xf32, #tpu.memory_space<vmem>>, vector<16x8xf32>
    %c352 = arith.constant 352 : index
    %c0_3 = arith.constant 0 : index
    %4 = vector.load %arg3[%c352, %c0_3] : memref<368x256xf32, #tpu.memory_space<vmem>>, vector<16x1xf32>
    %c0_4 = arith.constant 0 : index
    %c0_5 = arith.constant 0 : index
    %5 = vector.load %arg0[%c0_4, %c0_5] : memref<8x256xf32, #tpu.memory_space<vmem>>, vector<8x256xf32>
    %cst = arith.constant 2.000000e+00 : f32
    %6 = vector.broadcast %cst : f32 to vector<8x256xf32>
    %7 = arith.mulf %5, %6 : vector<8x256xf32>
    %cst_6 = arith.constant 1.000000e+00 : f32
    %8 = vector.broadcast %cst_6 : f32 to vector<8x256xf32>
    %9 = arith.subf %7, %8 : vector<8x256xf32>
    %c0_7 = arith.constant 0 : index
    %c0_8 = arith.constant 0 : index
    %10 = vector.load %arg1[%c0_7, %c0_8] : memref<8x256xf32, #tpu.memory_space<vmem>>, vector<8x256xf32>
    %cst_9 = arith.constant 0.000000e+00 : f32
    %11 = vector.broadcast %cst_9 : f32 to vector<8x256xf32>
    %12 = arith.cmpf one, %10, %11 : vector<8x256xf32>
    %cst_10 = arith.constant 0.993172228 : f32
    %13 = vector.broadcast %cst_10 : f32 to vector<8x256xf32>
    %14 = arith.mulf %13, %9 : vector<8x256xf32>
    %c0_11 = arith.constant 0 : index
    %c0_12 = arith.constant 0 : index
    %c0_13 = arith.constant 0 : index
    %15 = vector.load %arg2[%c0_11, %c0_12, %c0_13] : memref<4x8x256xf32, #tpu.memory_space<vmem>>, vector<1x8x256xf32>
    %16 = vector.shape_cast %15 : vector<1x8x256xf32> to vector<8x256xf32>
    %cst_14 = arith.constant 0.116657294 : f32
    %17 = vector.broadcast %cst_14 : f32 to vector<8x256xf32>
    %18 = arith.mulf %17, %16 : vector<8x256xf32>
    %19 = arith.addf %14, %18 : vector<8x256xf32>
    %c192 = arith.constant 192 : index
    %c0_15 = arith.constant 0 : index
    %20 = vector.load %arg3[%c192, %c0_15] : memref<368x256xf32, #tpu.memory_space<vmem>>, vector<64x256xf32>
    %cst_16 = arith.constant dense<0.000000e+00> : vector<64x256xf32>
    %21 = tpu.matmul %0, %19, %cst_16 {dimension_numbers = #tpu.dot_dimension_numbers<[1], [0], [0], [1], [0, 0, 1, 1], [], []>} : vector<64x8xf32>, vector<8x256xf32>, vector<64x256xf32> -> vector<64x256xf32>
    %22 = arith.addf %21, %20 : vector<64x256xf32>
    %23 = math.tanh %22 : vector<64x256xf32>
    %cst_17 = arith.constant dense<0.000000e+00> : vector<8x256xf32>
    %24 = tpu.matmul %1, %23, %cst_17 {dimension_numbers = #tpu.dot_dimension_numbers<[1], [0], [0], [1], [0, 0, 1, 1], [], []>} : vector<8x64xf32>, vector<64x256xf32>, vector<8x256xf32> -> vector<8x256xf32>
    %25 = arith.addf %24, %2 : vector<8x256xf32>
    %cst_18 = arith.constant 1.00687468 : f32
    %26 = vector.broadcast %cst_18 : f32 to vector<8x256xf32>
    %27 = arith.mulf %26, %19 : vector<8x256xf32>
    %cst_19 = arith.constant 0.117459275 : f32
    %28 = vector.broadcast %cst_19 : f32 to vector<8x256xf32>
    %29 = arith.mulf %28, %25 : vector<8x256xf32>
    %30 = arith.subf %27, %29 : vector<8x256xf32>
    %cst_20 = arith.constant -1.000000e+00 : f32
    %cst_21 = arith.constant 1.000000e+00 : f32
    %31 = vector.broadcast %cst_20 : f32 to vector<8x256xf32>
    %32 = arith.maximumf %31, %30 : vector<8x256xf32>
    %33 = vector.broadcast %cst_21 : f32 to vector<8x256xf32>
    %34 = arith.minimumf %33, %32 : vector<8x256xf32>
    %cst_22 = arith.constant 0.288204342 : f32
    %35 = vector.broadcast %cst_22 : f32 to vector<8x256xf32>
    %36 = arith.mulf %35, %34 : vector<8x256xf32>
    %cst_23 = arith.constant 0.713198066 : f32
    %37 = vector.broadcast %cst_23 : f32 to vector<8x256xf32>
    %38 = arith.mulf %37, %19 : vector<8x256xf32>
    %39 = arith.addf %36, %38 : vector<8x256xf32>
    %cst_24 = arith.constant 0.996532917 : f32
    %40 = vector.broadcast %cst_24 : f32 to vector<8x256xf32>
    %41 = arith.mulf %40, %9 : vector<8x256xf32>
    %c1 = arith.constant 1 : index
    %c0_25 = arith.constant 0 : index
    %c0_26 = arith.constant 0 : index
    %42 = vector.load %arg2[%c1, %c0_25, %c0_26] : memref<4x8x256xf32, #tpu.memory_space<vmem>>, vector<1x8x256xf32>
    %43 = vector.shape_cast %42 : vector<1x8x256xf32> to vector<8x256xf32>
    %cst_27 = arith.constant 0.0831997544 : f32
    %44 = vector.broadcast %cst_27 : f32 to vector<8x256xf32>
    %45 = arith.mulf %44, %43 : vector<8x256xf32>
    %46 = arith.addf %41, %45 : vector<8x256xf32>
    %47 = arith.select %12, %39, %46 : vector<8x256xi1>, vector<8x256xf32>
    %c128 = arith.constant 128 : index
    %c0_28 = arith.constant 0 : index
    %48 = vector.load %arg3[%c128, %c0_28] : memref<368x256xf32, #tpu.memory_space<vmem>>, vector<64x256xf32>
    %cst_29 = arith.constant dense<0.000000e+00> : vector<64x256xf32>
    %49 = tpu.matmul %0, %47, %cst_29 {dimension_numbers = #tpu.dot_dimension_numbers<[1], [0], [0], [1], [0, 0, 1, 1], [], []>} : vector<64x8xf32>, vector<8x256xf32>, vector<64x256xf32> -> vector<64x256xf32>
    %50 = arith.addf %49, %48 : vector<64x256xf32>
    %51 = math.tanh %50 : vector<64x256xf32>
    %cst_30 = arith.constant dense<0.000000e+00> : vector<8x256xf32>
    %52 = tpu.matmul %1, %51, %cst_30 {dimension_numbers = #tpu.dot_dimension_numbers<[1], [0], [0], [1], [0, 0, 1, 1], [], []>} : vector<8x64xf32>, vector<64x256xf32>, vector<8x256xf32> -> vector<8x256xf32>
    %53 = arith.addf %52, %2 : vector<8x256xf32>
    %cst_31 = arith.constant 1.00347912 : f32
    %54 = vector.broadcast %cst_31 : f32 to vector<8x256xf32>
    %55 = arith.mulf %54, %47 : vector<8x256xf32>
    %cst_32 = arith.constant 0.0834892243 : f32
    %56 = vector.broadcast %cst_32 : f32 to vector<8x256xf32>
    %57 = arith.mulf %56, %53 : vector<8x256xf32>
    %58 = arith.subf %55, %57 : vector<8x256xf32>
    %cst_33 = arith.constant -1.000000e+00 : f32
    %cst_34 = arith.constant 1.000000e+00 : f32
    %59 = vector.broadcast %cst_33 : f32 to vector<8x256xf32>
    %60 = arith.maximumf %59, %58 : vector<8x256xf32>
    %61 = vector.broadcast %cst_34 : f32 to vector<8x256xf32>
    %62 = arith.minimumf %61, %60 : vector<8x256xf32>
    %cst_35 = arith.constant 0.41068545 : f32
    %63 = vector.broadcast %cst_35 : f32 to vector<8x256xf32>
    %64 = arith.mulf %63, %62 : vector<8x256xf32>
    %cst_36 = arith.constant 0.590154529 : f32
    %65 = vector.broadcast %cst_36 : f32 to vector<8x256xf32>
    %66 = arith.mulf %65, %47 : vector<8x256xf32>
    %67 = arith.addf %64, %66 : vector<8x256xf32>
    %cst_37 = arith.constant 0.99879384 : f32
    %68 = vector.broadcast %cst_37 : f32 to vector<8x256xf32>
    %69 = arith.mulf %68, %9 : vector<8x256xf32>
    %c2 = arith.constant 2 : index
    %c0_38 = arith.constant 0 : index
    %c0_39 = arith.constant 0 : index
    %70 = vector.load %arg2[%c2, %c0_38, %c0_39] : memref<4x8x256xf32, #tpu.memory_space<vmem>>, vector<1x8x256xf32>
    %71 = vector.shape_cast %70 : vector<1x8x256xf32> to vector<8x256xf32>
    %cst_40 = arith.constant 0.0491007119 : f32
    %72 = vector.broadcast %cst_40 : f32 to vector<8x256xf32>
    %73 = arith.mulf %72, %71 : vector<8x256xf32>
    %74 = arith.addf %69, %73 : vector<8x256xf32>
    %75 = arith.select %12, %67, %74 : vector<8x256xi1>, vector<8x256xf32>
    %c64 = arith.constant 64 : index
    %c0_41 = arith.constant 0 : index
    %76 = vector.load %arg3[%c64, %c0_41] : memref<368x256xf32, #tpu.memory_space<vmem>>, vector<64x256xf32>
    %cst_42 = arith.constant dense<0.000000e+00> : vector<64x256xf32>
    %77 = tpu.matmul %0, %75, %cst_42 {dimension_numbers = #tpu.dot_dimension_numbers<[1], [0], [0], [1], [0, 0, 1, 1], [], []>} : vector<64x8xf32>, vector<8x256xf32>, vector<64x256xf32> -> vector<64x256xf32>
    %78 = arith.addf %77, %76 : vector<64x256xf32>
    %79 = math.tanh %78 : vector<64x256xf32>
    %cst_43 = arith.constant dense<0.000000e+00> : vector<8x256xf32>
    %80 = tpu.matmul %1, %79, %cst_43 {dimension_numbers = #tpu.dot_dimension_numbers<[1], [0], [0], [1], [0, 0, 1, 1], [], []>} : vector<8x64xf32>, vector<64x256xf32>, vector<8x256xf32> -> vector<8x256xf32>
    %81 = arith.addf %80, %2 : vector<8x256xf32>
    %cst_44 = arith.constant 1.00120759 : f32
    %82 = vector.broadcast %cst_44 : f32 to vector<8x256xf32>
    %83 = arith.mulf %82, %75 : vector<8x256xf32>
    %cst_45 = arith.constant 0.0491600074 : f32
    %84 = vector.broadcast %cst_45 : f32 to vector<8x256xf32>
    %85 = arith.mulf %84, %81 : vector<8x256xf32>
    %86 = arith.subf %83, %85 : vector<8x256xf32>
    %cst_46 = arith.constant -1.000000e+00 : f32
    %cst_47 = arith.constant 1.000000e+00 : f32
    %87 = vector.broadcast %cst_46 : f32 to vector<8x256xf32>
    %88 = arith.maximumf %87, %86 : vector<8x256xf32>
    %89 = vector.broadcast %cst_47 : f32 to vector<8x256xf32>
    %90 = arith.minimumf %89, %88 : vector<8x256xf32>
    %cst_48 = arith.constant 0.79653263 : f32
    %91 = vector.broadcast %cst_48 : f32 to vector<8x256xf32>
    %92 = arith.mulf %91, %90 : vector<8x256xf32>
    %cst_49 = arith.constant 0.203663036 : f32
    %93 = vector.broadcast %cst_49 : f32 to vector<8x256xf32>
    %94 = arith.mulf %93, %75 : vector<8x256xf32>
    %95 = arith.addf %92, %94 : vector<8x256xf32>
    %cst_50 = arith.constant 0.999949991 : f32
    %96 = vector.broadcast %cst_50 : f32 to vector<8x256xf32>
    %97 = arith.mulf %96, %9 : vector<8x256xf32>
    %c3 = arith.constant 3 : index
    %c0_51 = arith.constant 0 : index
    %c0_52 = arith.constant 0 : index
    %98 = vector.load %arg2[%c3, %c0_51, %c0_52] : memref<4x8x256xf32, #tpu.memory_space<vmem>>, vector<1x8x256xf32>
    %99 = vector.shape_cast %98 : vector<1x8x256xf32> to vector<8x256xf32>
    %cst_53 = arith.constant 0.00999999977 : f32
    %100 = vector.broadcast %cst_53 : f32 to vector<8x256xf32>
    %101 = arith.mulf %100, %99 : vector<8x256xf32>
    %102 = arith.addf %97, %101 : vector<8x256xf32>
    %103 = arith.select %12, %95, %102 : vector<8x256xi1>, vector<8x256xf32>
    %c0_54 = arith.constant 0 : index
    %c0_55 = arith.constant 0 : index
    %104 = vector.load %arg3[%c0_54, %c0_55] : memref<368x256xf32, #tpu.memory_space<vmem>>, vector<64x256xf32>
    %cst_56 = arith.constant dense<0.000000e+00> : vector<64x256xf32>
    %105 = tpu.matmul %0, %103, %cst_56 {dimension_numbers = #tpu.dot_dimension_numbers<[1], [0], [0], [1], [0, 0, 1, 1], [], []>} : vector<64x8xf32>, vector<8x256xf32>, vector<64x256xf32> -> vector<64x256xf32>
    %106 = arith.addf %105, %104 : vector<64x256xf32>
    %107 = math.tanh %106 : vector<64x256xf32>
    %cst_57 = arith.constant dense<0.000000e+00> : vector<8x256xf32>
    %108 = tpu.matmul %1, %107, %cst_57 {dimension_numbers = #tpu.dot_dimension_numbers<[1], [0], [0], [1], [0, 0, 1, 1], [], []>} : vector<8x64xf32>, vector<64x256xf32>, vector<8x256xf32> -> vector<8x256xf32>
    %109 = arith.addf %108, %2 : vector<8x256xf32>
    %cst_58 = arith.constant 1.000050e+00 : f32
    %110 = vector.broadcast %cst_58 : f32 to vector<8x256xf32>
    %111 = arith.mulf %110, %103 : vector<8x256xf32>
    %cst_59 = arith.constant 1.000050e-02 : f32
    %112 = vector.broadcast %cst_59 : f32 to vector<8x256xf32>
    %113 = arith.mulf %112, %109 : vector<8x256xf32>
    %114 = arith.subf %111, %113 : vector<8x256xf32>
    %cst_60 = arith.constant -1.000000e+00 : f32
    %cst_61 = arith.constant 1.000000e+00 : f32
    %115 = vector.broadcast %cst_60 : f32 to vector<8x256xf32>
    %116 = arith.maximumf %115, %114 : vector<8x256xf32>
    %117 = vector.broadcast %cst_61 : f32 to vector<8x256xf32>
    %118 = arith.minimumf %117, %116 : vector<8x256xf32>
    %cst_62 = arith.constant 1.000000e+00 : f32
    %119 = vector.broadcast %cst_62 : f32 to vector<8x256xf32>
    %120 = arith.mulf %119, %118 : vector<8x256xf32>
    %cst_63 = arith.constant 0.000000e+00 : f32
    %121 = vector.broadcast %cst_63 : f32 to vector<8x256xf32>
    %122 = arith.mulf %121, %103 : vector<8x256xf32>
    %123 = arith.addf %120, %122 : vector<8x256xf32>
    %124 = arith.select %12, %123, %9 : vector<8x256xi1>, vector<8x256xf32>
    %cst_64 = arith.constant dense<0.000000e+00> : vector<16x256xf32>
    %125 = tpu.matmul %3, %124, %cst_64 {dimension_numbers = #tpu.dot_dimension_numbers<[1], [0], [0], [1], [0, 0, 1, 1], [], []>} : vector<16x8xf32>, vector<8x256xf32>, vector<16x256xf32> -> vector<16x256xf32>
    %cst_65 = arith.constant dense<0.000000e+00> : vector<16xf32>
    %126 = vector.multi_reduction <add>, %125, %cst_65 [1] : vector<16x256xf32> to vector<16xf32>
    %127 = vector.shape_cast %126 : vector<16xf32> to vector<16x1xf32>
    %128 = arith.addf %127, %4 : vector<16x1xf32>
    %c0_66 = arith.constant 0 : index
    %c0_67 = arith.constant 0 : index
    %129 = vector.load %arg4[%c0_66, %c0_67] : memref<16x1xf32, #tpu.memory_space<vmem>>, vector<16x1xf32>
    tpu.vector_store %arg4[%c0_66, %c0_67], %128 {strides = array<i32>} : memref<16x1xf32, #tpu.memory_space<vmem>>, vector<16x1xf32>,
    return
  }
}

</mosaic_0001>

<bundles_post_ra>
// kernel: region_denoised_classifier.1
= control target key start
LH: loop header
LB: loop body
LE: loop exit
PB: predicated region body
PF: predicated region fallthrough
CT: control target
= control target key end

     0   :  { %v1385_v3 = vmov 0.0   ;;  %vm66_vm0 = vcmask 64512   ;;  %vm220_vm1 = vcmask 523264   ;;  %vm1131_vm4 = vcmask 7168   ;;  %s1908_s0 = inlined_call_operand.vmem [shape: f32[8,256], index: 0, kind: input, shape index: {}]   ;;  %s1909_s2 = inlined_call_operand.vmem [shape: f32[4,8,256], index: 2, kind: input, shape index: {}]   ;;  %s1910_s3 = inlined_call_operand.vmem [shape: f32[368,256], index: 3, kind: input, shape index: {}]   ;;  %s1911_s1 = inlined_call_operand.vmem [shape: f32[8,256], index: 1, kind: input, shape index: {}]   ;;  %s1912_s4 = inlined_call_operand.vmem [shape: f32[16,1], index: 4, kind: output, shape index: {}]  }
   0x1   :  { %v33_v0 = vld [vmem:[%s1908_s0 + $0x8] sm:$0xff]  ;;  %v32_v2 = vld [vmem:[%s1908_s0] sm:$0xff]  ;;  %155 = vmatprep.mubr.f32.mxu0 %v1385_v3  ;;  %288 = vmatprep.mubr.f32.mxu1 %v1385_v3  ;;  %v1448_v16 = vld [vmem:[%s1910_s3 + $0x210] sm:$0xff] }
   0x2   :  { %v45_v1 = vld [vmem:[%s1909_s2 + $0x8] sm:$0xff]  ;;  %v35_v4 = vmul.f32 2.0, %v33_v0  ;;  %v34_v5 = vmul.f32 2.0, %v32_v2  ;;  %v44_v6 = vld [vmem:[%s1909_s2] sm:$0xff]  ;;  %v1464_v18 = vld [vmem:[%s1910_s3 + $0x230] sm:$0xff] }
   0x3   :  { %v47_v8 = vmul.f32 0.116657294, %v45_v1  ;;  %v46_v10 = vmul.f32 0.116657294, %v44_v6  ;;  %v1438_v15 = vld [vmem:[%s1910_s3 + $0x200] sm:$0xff]  ;;  %v1480_v20 = vld [vmem:[%s1910_s3 + $0x250] sm:$0xff] }
   0x4   :  { %v1425_v7 = vadd.f32 -1.0, %v35_v4  ;;  %v1427_v9 = vadd.f32 -1.0, %v34_v5  ;;  %v1456_v17 = vld [vmem:[%s1910_s3 + $0x220] sm:$0xff]  ;;  %v1496_v22 = vld [vmem:[%s1910_s3 + $0x270] sm:$0xff]  ;;  %v51_v24 = vld [vmem:[%s1910_s3 + $0x188] sm:$0xff] }
   0x5   :  { %v1472_v19 = vld [vmem:[%s1910_s3 + $0x240] sm:$0xff]  ;;  %v52_v29 = vld [vmem:[%s1910_s3 + $0x190] sm:$0xff]  ;;  %v53_v30 = vld [vmem:[%s1910_s3 + $0x198] sm:$0xff] }
   0x6   :  { %v43_v11 = vmul.f32 0.9931722, %v1425_v7  ;;  %v42_v12 = vmul.f32 0.9931722, %v1427_v9  ;;  %v1488_v21 = vld [vmem:[%s1910_s3 + $0x260] sm:$0xff]  ;;  %v55_v36 = vld [vmem:[%s1910_s3 + $0x1a8] sm:$0xff] }
   0x7   :  { %v50_v23 = vld [vmem:[%s1910_s3 + $0x180] sm:$0xff]  ;;  %v56_v41 = vld [vmem:[%s1910_s3 + $0x1b0] sm:$0xff]  ;;  %v57_v42 = vld [vmem:[%s1910_s3 + $0x1b8] sm:$0xff] }
   0x8   :  { %v1431_v13 = vadd.f32 %v47_v8, %v43_v11  ;;  %v1433_v14 = vadd.f32 %v46_v10, %v42_v12  ;;  %v54_v35 = vld [vmem:[%s1910_s3 + $0x1a0] sm:$0xff]  ;;  %v59_v49 = vld [vmem:[%s1910_s3 + $0x1c8] sm:$0xff]  ;;  %v60_v57 = vld [vmem:[%s1910_s3 + $0x1d0] sm:$0xff] }
   0x9   :  { %v58_v47 = vld [vmem:[%s1910_s3 + $0x1c0] sm:$0xff]  ;;  %v61_v59 = vld [vmem:[%s1910_s3 + $0x1d8] sm:$0xff]  ;;  %v63_v4 = vld [vmem:[%s1910_s3 + $0x1e8] sm:$0xff] }
   0xa   :  { %91 = vmatprep.subr.mxu0 %v1431_v13  ;;  %v62_v1 = vld [vmem:[%s1910_s3 + $0x1e0] sm:$0xff] }
   0xb   :  { %92 = vmatpush1.msra.mxu0 %v1433_v14 }
   0xc   :  { %1140 = vmatmul.mubr.msk.f32.vlgmr.msra.gmra.mrb[0].mxu0 %vm66_vm0, %v1438_v15 }
   0xd   :  { %161 = vmatprep.mubr.f32.mxu0 %v1385_v3 }
  0x10   :  { %1141 = vmatmul.mubr.msk.f32.gmra.mrb[2].mxu0 %vm66_vm0, %v1448_v16 }
  0x11   :  { %167 = vmatprep.mubr.f32.mxu0 %v1385_v3 }
  0x14   :  { %1142 = vmatmul.mubr.msk.f32.gmra.mrb[4].mxu0 %vm66_vm0, %v1456_v17 }
  0x15   :  { %173 = vmatprep.mubr.f32.mxu0 %v1385_v3 }
  0x18   :  { %1143 = vmatmul.mubr.msk.f32.gmra.mrb[6].mxu0 %vm66_vm0, %v1464_v18 }
  0x19   :  { %179 = vmatprep.mubr.f32.mxu0 %v1385_v3 }
  0x1c   :  { %1144 = vmatmul.mubr.msk.f32.gmra.mrb[8].mxu0 %vm66_vm0, %v1472_v19 }
  0x1d   :  { %185 = vmatprep.mubr.f32.mxu0 %v1385_v3 }
  0x20   :  { %1145 = vmatmul.mubr.msk.f32.gmra.mrb[10].mxu0 %vm66_vm0, %v1480_v20 }
  0x21   :  { %191 = vmatprep.mubr.f32.mxu0 %v1385_v3 }
  0x24   :  { %1146 = vmatmul.mubr.msk.f32.gmra.mrb[12].mxu0 %vm66_vm0, %v1488_v21 }
  0x25   :  { %197 = vmatprep.mubr.f32.mxu0 %v1385_v3 }
  0x28   :  { %1147 = vmatmul.mubr.msk.f32.gmra.mrb[14].mxu0 %vm66_vm0, %v1496_v22 }
  0x29   :  { %531 = vmatprep.mubr.f32.mxu0 %v1385_v3 }
  0xdf   :  { %v157_v25 = vpop.f32.mrb[0].mxu0 }
  0xe0   :  { %v158_v26 = vadd.f32 %v157_v25, %v50_v23  ;;  %v159_v27 = vpop.f32.mrb[1].mxu0 }
  0xe1   :  { %v160_v28 = vadd.f32 %v159_v27, %v51_v24  ;;  %v64_v24 = vld [vmem:[%s1910_s3 + $0x1f0] sm:$0xff] }
  0xe2   :  { %1257 = vtanh.f32 %v158_v26  ;;  %v65_v26 = vld [vmem:[%s1910_s3 + $0x1f8] sm:$0xff] }
  0xe3   :  { %v163_v31 = vpop.f32.mrb[2].mxu0  ;;  %1259 = vtanh.f32 %v160_v28 }
  0xe4   :  { %v164_v32 = vadd.f32 %v163_v31, %v52_v29  ;;  %v165_v33 = vpop.f32.mrb[3].mxu0 }
  0xe5   :  { %v166_v34 = vadd.f32 %v165_v33, %v53_v30 }
  0xe6   :  { %1261 = vtanh.f32 %v164_v32 }
  0xe7   :  { %1263 = vtanh.f32 %v166_v34  ;;  %v169_v37 = vpop.f32.mrb[4].mxu0 }
  0xe8   :  { %v170_v38 = vadd.f32 %v169_v37, %v54_v35  ;;  %v171_v39 = vpop.f32.mrb[5].mxu0 }
  0xe9   :  { %v172_v40 = vadd.f32 %v171_v39, %v55_v36 }
  0xea   :  { %1265 = vtanh.f32 %v170_v38 }
  0xeb   :  { %v175_v43 = vpop.f32.mrb[6].mxu0  ;;  %1267 = vtanh.f32 %v172_v40 }
  0xec   :  { %v176_v44 = vadd.f32 %v175_v43, %v56_v41  ;;  %v177_v45 = vpop.f32.mrb[7].mxu0  ;;  %v1258_v48 = vpop.eup %1257 }
  0xed   :  { %v178_v46 = vadd.f32 %v177_v45, %v57_v42  ;;  %v1260_v50 = vpop.eup %1259  ;;  %v1560_v45 = vld [vmem:[%s1910_s3 + $0x290] sm:$0xff] }
  0xee   :  { %1269 = vtanh.f32 %v176_v44  ;;  %v1552_v44 = vld [vmem:[%s1910_s3 + $0x280] sm:$0xff] }
  0xef   :  { %1271 = vtanh.f32 %v178_v46  ;;  %v181_v51 = vpop.f32.mrb[8].mxu0  ;;  %v1565_v46 = vld [vmem:[%s1910_s3 + $0x298] sm:$0xff] }
  0xf0   :  { %v1262_v52 = vpop.eup %1261  ;;  %v182_v53 = vadd.f32 %v181_v51, %v58_v47  ;;  %v183_v54 = vpop.f32.mrb[9].mxu0 }
  0xf1   :  { %v1264_v55 = vpop.eup %1263  ;;  %v184_v56 = vadd.f32 %v183_v54, %v59_v49  ;;  %v1194_v58 = vpack.c.bf16 %v1262_v52, %v1258_v48  ;;  %v295_v49 = vmul.f32 1.0068747, %v1433_v14  ;;  %v296_v52 = vmul.f32 1.0068747, %v1431_v13  ;;  %v1152_v54 = vld [vmem:[%s1909_s2 + $0x18] sm:$0xff] }
  0xf2   :  { %v1192_v60 = vpack.c.bf16 %v1264_v55, %v1260_v50  ;;  %1273 = vtanh.f32 %v182_v53 }
  0xf3   :  { %v187_v61 = vpop.f32.mrb[10].mxu0  ;;  %1275 = vtanh.f32 %v184_v56  ;;  %v1151_v56 = vld [vmem:[%s1909_s2 + $0x10] sm:$0xff] }
  0xf4   :  { %v188_v62 = vadd.f32 %v187_v61, %v60_v57  ;;  %v189_v63 = vpop.f32.mrb[11].mxu0  ;;  %1193 = vmatprep.subr.bf16.mxu1 %v1192_v60  ;;  %v1266_v2 = vpop.eup %1265  ;;  %v312_v60 = vmul.f32 0.9965329, %v1425_v7  ;;  %v317_v61 = vmul.f32 0.083199754, %v1152_v54 }
  0xf5   :  { %v190_v0 = vadd.f32 %v189_v63, %v61_v59  ;;  %1195 = vmatpush1.bf16.msra.mxu1 %v1194_v58  ;;  %v1268_v5 = vpop.eup %1267  ;;  %v307_v58 = vmul.f32 0.71319807, %v1433_v14  ;;  %v311_v63 = vmul.f32 0.9965329, %v1427_v9  ;;  %v1589_v14 = vld [vmem:[%s1911_s1] sm:$0xff] }
  0xf6   :  { %1277 = vtanh.f32 %v188_v62  ;;  %vm40_vm3 = vcmp.ne.f32.partialorder %v1589_v14, 0.0 }
  0xf7   :  { %1279 = vtanh.f32 %v190_v0  ;;  %v193_v6 = vpop.f32.mrb[12].mxu0  ;;  %v316_v0 = vmul.f32 0.083199754, %v1151_v56 }
  0xf8   :  { %v1270_v8 = vpop.eup %1269  ;;  %v194_v10 = vadd.f32 %v193_v6, %v62_v1  ;;  %v195_v11 = vpop.f32.mrb[13].mxu0 }
  0xf9   :  { %v1272_v12 = vpop.eup %1271  ;;  %v196_v23 = vadd.f32 %v195_v11, %v63_v4  ;;  %v1198_v25 = vpack.c.bf16 %v1270_v8, %v1266_v2  ;;  %v308_v2 = vmul.f32 0.71319807, %v1431_v13  ;;  %v1584_v4 = vld [vmem:[%s1911_s1 + $0x8] sm:$0xff]  ;;  %v319_v8 = vadd.f32 %v317_v61, %v312_v60  ;;  %v332_v61 = vld [vmem:[%s1910_s3 + $0x150] sm:$0xff] }
  0xfa   :  { %v1196_v27 = vpack.c.bf16 %v1272_v12, %v1268_v5  ;;  %1281 = vtanh.f32 %v194_v10  ;;  %vm41_vm2 = vcmp.ne.f32.partialorder %v1584_v4, 0.0  ;;  %v318_v11 = vadd.f32 %v316_v0, %v311_v63  ;;  %v333_v63 = vld [vmem:[%s1910_s3 + $0x158] sm:$0xff] }
  0xfb   :  { %v199_v28 = vpop.f32.mrb[14].mxu0  ;;  %1283 = vtanh.f32 %v196_v23 }
  0xfc   :  { %v200_v29 = vadd.f32 %v199_v28, %v64_v24  ;;  %v201_v30 = vpop.f32.mrb[15].mxu0  ;;  %1197 = vmatprep.subr.bf16.mxu1 %v1196_v27  ;;  %v1274_v32 = vpop.eup %1273  ;;  %v322_v24 = vld [vmem:[%s1910_s3 + $0x100] sm:$0xff] }
  0xfd   :  { %v202_v31 = vadd.f32 %v201_v30, %v65_v26  ;;  %1199 = vmatpush1.bf16.msra.mxu1 %v1198_v25  ;;  %v1276_v33 = vpop.eup %1275  ;;  %v323_v25 = vld [vmem:[%s1910_s3 + $0x108] sm:$0xff]  ;;  %v324_v30 = vld [vmem:[%s1910_s3 + $0x110] sm:$0xff] }
  0xfe   :  { %1285 = vtanh.f32 %v200_v29 }
  0xff   :  { %1287 = vtanh.f32 %v202_v31  ;;  %v325_v31 = vld [vmem:[%s1910_s3 + $0x118] sm:$0xff] }
 0x100   :  { %v1278_v34 = vpop.eup %1277 }
 0x101   :  { %v1280_v35 = vpop.eup %1279  ;;  %v1202_v36 = vpack.c.bf16 %v1278_v34, %v1274_v32 }
 0x102   :  { %v1200_v37 = vpack.c.bf16 %v1280_v35, %v1276_v33 }
 0x104   :  { %1201 = vmatprep.subr.bf16.mxu1 %v1200_v37  ;;  %v1282_v38 = vpop.eup %1281  ;;  %v327_v37 = vld [vmem:[%s1910_s3 + $0x128] sm:$0xff] }
 0x105   :  { %1203 = vmatpush1.bf16.msra.mxu1 %v1202_v36  ;;  %v1284_v39 = vpop.eup %1283  ;;  %v326_v36 = vld [vmem:[%s1910_s3 + $0x120] sm:$0xff] }
 0x108   :  { %v1286_v40 = vpop.eup %1285 }
 0x109   :  { %v1288_v41 = vpop.eup %1287  ;;  %v1206_v42 = vpack.c.bf16 %v1286_v40, %v1282_v38 }
 0x10a   :  { %v1204_v43 = vpack.c.bf16 %v1288_v41, %v1284_v39 }
 0x10c   :  { %1205 = vmatprep.subr.bf16.mxu1 %v1204_v43  ;;  %v329_v43 = vld [vmem:[%s1910_s3 + $0x138] sm:$0xff] }
 0x10d   :  { %1207 = vmatpush1.bf16.msra.mxu1 %v1206_v42  ;;  %v328_v42 = vld [vmem:[%s1910_s3 + $0x130] sm:$0xff] }
 0x110   :  { %1148 = vmatmul.mubr.msk.f32.vlgmr.msra.gmra.mrb[0].mxu1 %vm220_vm1, %v1552_v44 }
 0x111   :  { %402 = vmatprep.mubr.f32.mxu1 %v1385_v3 }
 0x1e3   :  { %v290_v47 = vpop.f32.mrb[0].mxu1 }
 0x1e4   :  { %v291_v48 = vadd.f32 %v290_v47, %v1560_v45  ;;  %v292_v50 = vpop.f32.mrb[1].mxu1 }
 0x1e5   :  { %v293_v51 = vadd.f32 %v292_v50, %v1565_v46 }
 0x1e6   :  { %v297_v53 = vmul.f32 0.117459275, %v291_v48 }
 0x1e7   :  { %v298_v55 = vmul.f32 0.117459275, %v293_v51  ;;  %v330_v51 = vld [vmem:[%s1910_s3 + $0x140] sm:$0xff] }
 0x1e8   :  { %v299_v57 = vsub.f32 %v295_v49, %v297_v53  ;;  %v331_v53 = vld [vmem:[%s1910_s3 + $0x148] sm:$0xff] }
 0x1e9   :  { %v300_v59 = vsub.f32 %v296_v52, %v298_v55 }
 0x1ea   :  { %v1149_v62 = vclamps-f32 %v299_v57, 1.0 }
 0x1eb   :  { %v1150_v1 = vclamps-f32 %v300_v59, 1.0 }
 0x1ec   :  { %v305_v5 = vmul.f32 0.28820434, %v1149_v62 }
 0x1ed   :  { %v306_v6 = vmul.f32 0.28820434, %v1150_v1 }
 0x1ee   :  { %v309_v10 = vadd.f32 %v307_v58, %v305_v5 }
 0x1ef   :  { %v310_v12 = vadd.f32 %v308_v2, %v306_v6 }
 0x1f0   :  { %v1600_v23 = vsel %vm40_vm3, %v309_v10, %v318_v11  ;;  %v335_v11 = vld [vmem:[%s1910_s3 + $0x168] sm:$0xff] }
 0x1f1   :  { %v1595_v13 = vsel %vm41_vm2, %v310_v12, %v319_v8  ;;  %v334_v8 = vld [vmem:[%s1910_s3 + $0x160] sm:$0xff] }
 0x1f2   :  { %338 = vmatprep.subr.mxu1 %v1595_v13 }
 0x1f3   :  { %339 = vmatpush1.msra.mxu1 %v1600_v23 }
 0x1f4   :  { %1153 = vmatmul.mubr.msk.f32.vlgmr.msra.gmra.mrb[2].mxu1 %vm66_vm0, %v1438_v15 }
 0x1f5   :  { %408 = vmatprep.mubr.f32.mxu1 %v1385_v3 }
 0x1f8   :  { %1154 = vmatmul.mubr.msk.f32.gmra.mrb[4].mxu1 %vm66_vm0, %v1448_v16 }
 0x1f9   :  { %414 = vmatprep.mubr.f32.mxu1 %v1385_v3 }
 0x1fc   :  { %1155 = vmatmul.mubr.msk.f32.gmra.mrb[6].mxu1 %vm66_vm0, %v1456_v17 }
 0x1fd   :  { %420 = vmatprep.mubr.f32.mxu1 %v1385_v3 }
 0x200   :  { %1156 = vmatmul.mubr.msk.f32.gmra.mrb[8].mxu1 %vm66_vm0, %v1464_v18 }
 0x201   :  { %426 = vmatprep.mubr.f32.mxu1 %v1385_v3 }
 0x204   :  { %1157 = vmatmul.mubr.msk.f32.gmra.mrb[10].mxu1 %vm66_vm0, %v1472_v19 }
 0x205   :  { %432 = vmatprep.mubr.f32.mxu1 %v1385_v3 }
 0x208   :  { %1158 = vmatmul.mubr.msk.f32.gmra.mrb[12].mxu1 %vm66_vm0, %v1480_v20 }
 0x209   :  { %438 = vmatprep.mubr.f32.mxu1 %v1385_v3 }
 0x20c   :  { %1159 = vmatmul.mubr.msk.f32.gmra.mrb[14].mxu1 %vm66_vm0, %v1488_v21 }
 0x20d   :  { %444 = vmatprep.mubr.f32.mxu1 %v1385_v3 }
 0x210   :  { %1160 = vmatmul.mubr.msk.f32.gmra.mrb[16].mxu1 %vm66_vm0, %v1496_v22 }
 0x211   :  { %774 = vmatprep.mubr.f32.mxu1 %v1385_v3 }
 0x2c7   :  { %v404_v26 = vpop.f32.mrb[2].mxu1 }
 0x2c8   :  { %v405_v27 = vadd.f32 %v404_v26, %v322_v24  ;;  %v406_v28 = vpop.f32.mrb[3].mxu1 }
 0x2c9   :  { %v407_v29 = vadd.f32 %v406_v28, %v323_v25 }
 0x2ca   :  { %1289 = vtanh.f32 %v405_v27 }
 0x2cb   :  { %v410_v32 = vpop.f32.mrb[4].mxu1  ;;  %1291 = vtanh.f32 %v407_v29 }
 0x2cc   :  { %v411_v33 = vadd.f32 %v410_v32, %v324_v30  ;;  %v412_v34 = vpop.f32.mrb[5].mxu1  ;;  %v336_v30 = vld [vmem:[%s1910_s3 + $0x170] sm:$0xff]  ;;  %v337_v32 = vld [vmem:[%s1910_s3 + $0x178] sm:$0xff] }
 0x2cd   :  { %v413_v35 = vadd.f32 %v412_v34, %v325_v31 }
 0x2ce   :  { %1293 = vtanh.f32 %v411_v33 }
 0x2cf   :  { %1295 = vtanh.f32 %v413_v35  ;;  %v416_v38 = vpop.f32.mrb[6].mxu1 }
 0x2d0   :  { %v417_v39 = vadd.f32 %v416_v38, %v326_v36  ;;  %v418_v40 = vpop.f32.mrb[7].mxu1 }
 0x2d1   :  { %v419_v41 = vadd.f32 %v418_v40, %v327_v37 }
 0x2d2   :  { %1297 = vtanh.f32 %v417_v39 }
 0x2d3   :  { %v422_v47 = vpop.f32.mrb[8].mxu1  ;;  %1299 = vtanh.f32 %v419_v41 }
 0x2d4   :  { %v423_v48 = vadd.f32 %v422_v47, %v328_v42  ;;  %v424_v49 = vpop.f32.mrb[9].mxu1  ;;  %v1290_v52 = vpop.eup %1289 }
 0x2d5   :  { %v425_v50 = vadd.f32 %v424_v49, %v329_v43  ;;  %v1292_v54 = vpop.eup %1291 }
 0x2d6   :  { %1301 = vtanh.f32 %v423_v48 }
 0x2d7   :  { %1303 = vtanh.f32 %v425_v50  ;;  %v428_v55 = vpop.f32.mrb[10].mxu1 }
 0x2d8   :  { %v1294_v56 = vpop.eup %1293  ;;  %v429_v57 = vadd.f32 %v428_v55, %v330_v51  ;;  %v430_v58 = vpop.f32.mrb[11].mxu1 }
 0x2d9   :  { %v1296_v59 = vpop.eup %1295  ;;  %v431_v60 = vadd.f32 %v430_v58, %v331_v53  ;;  %v1210_v62 = vpack.c.bf16 %v1294_v56, %v1290_v52 }
 0x2da   :  { %v1208_v0 = vpack.c.bf16 %v1296_v59, %v1292_v54  ;;  %1305 = vtanh.f32 %v429_v57  ;;  %v538_v57 = vmul.f32 1.0034791, %v1600_v23  ;;  %v1165_v59 = vld [vmem:[%s1909_s2 + $0x28] sm:$0xff] }
 0x2db   :  { %v434_v1 = vpop.f32.mrb[12].mxu1  ;;  %1307 = vtanh.f32 %v431_v60  ;;  %v539_v60 = vmul.f32 1.0034791, %v1595_v13 }
 0x2dc   :  { %v435_v2 = vadd.f32 %v434_v1, %v332_v61  ;;  %v436_v5 = vpop.f32.mrb[13].mxu1  ;;  %1209 = vmatprep.subr.bf16.mxu0 %v1208_v0  ;;  %v1298_v10 = vpop.eup %1297  ;;  %v555_v1 = vmul.f32 0.99879384, %v1425_v7 }
 0x2dd   :  { %v437_v6 = vadd.f32 %v436_v5, %v333_v63  ;;  %1211 = vmatpush1.bf16.msra.mxu0 %v1210_v62  ;;  %v1300_v12 = vpop.eup %1299  ;;  %v1164_v62 = vld [vmem:[%s1909_s2 + $0x20] sm:$0xff] }
 0x2de   :  { %1309 = vtanh.f32 %v435_v2  ;;  %v560_v2 = vmul.f32 0.049100712, %v1165_v59  ;;  %v574_v59 = vld [vmem:[%s1910_s3 + $0xc8] sm:$0xff] }
 0x2df   :  { %1311 = vtanh.f32 %v437_v6  ;;  %v440_v24 = vpop.f32.mrb[14].mxu1  ;;  %v554_v6 = vmul.f32 0.99879384, %v1427_v9 }
 0x2e0   :  { %v1302_v25 = vpop.eup %1301  ;;  %v441_v26 = vadd.f32 %v440_v24, %v334_v8  ;;  %v442_v27 = vpop.f32.mrb[15].mxu1  ;;  %v559_v8 = vmul.f32 0.049100712, %v1164_v62  ;;  %v551_v24 = vmul.f32 0.5901545, %v1595_v13  ;;  %v565_v13 = vld [vmem:[%s1910_s3 + $0x80] sm:$0xff] }
 0x2e1   :  { %v1304_v28 = vpop.eup %1303  ;;  %v443_v29 = vadd.f32 %v442_v27, %v335_v11  ;;  %v1214_v31 = vpack.c.bf16 %v1302_v25, %v1298_v10  ;;  %v550_v11 = vmul.f32 0.5901545, %v1600_v23  ;;  %v566_v23 = vld [vmem:[%s1910_s3 + $0x88] sm:$0xff] }
 0x2e2   :  { %v1212_v33 = vpack.c.bf16 %v1304_v28, %v1300_v12  ;;  %1313 = vtanh.f32 %v441_v26  ;;  %v562_v26 = vadd.f32 %v560_v2, %v555_v1  ;;  %v561_v28 = vadd.f32 %v559_v8, %v554_v6  ;;  %v576_v8 = vld [vmem:[%s1910_s3 + $0xd8] sm:$0xff] }
 0x2e3   :  { %v446_v34 = vpop.f32.mrb[16].mxu1  ;;  %1315 = vtanh.f32 %v443_v29 }
 0x2e4   :  { %v447_v35 = vadd.f32 %v446_v34, %v336_v30  ;;  %v448_v36 = vpop.f32.mrb[17].mxu1  ;;  %1213 = vmatprep.subr.bf16.mxu0 %v1212_v33  ;;  %v1306_v38 = vpop.eup %1305 }
 0x2e5   :  { %v449_v37 = vadd.f32 %v448_v36, %v337_v32  ;;  %1215 = vmatpush1.bf16.msra.mxu0 %v1214_v31  ;;  %v1308_v39 = vpop.eup %1307  ;;  %v567_v36 = vld [vmem:[%s1910_s3 + $0x90] sm:$0xff] }
 0x2e6   :  { %1317 = vtanh.f32 %v447_v35 }
 0x2e7   :  { %1319 = vtanh.f32 %v449_v37  ;;  %v568_v37 = vld [vmem:[%s1910_s3 + $0x98] sm:$0xff] }
 0x2e8   :  { %v1310_v40 = vpop.eup %1309 }
 0x2e9   :  { %v1312_v41 = vpop.eup %1311  ;;  %v1218_v42 = vpack.c.bf16 %v1310_v40, %v1306_v38 }
 0x2ea   :  { %v1216_v43 = vpack.c.bf16 %v1312_v41, %v1308_v39 }
 0x2ec   :  { %1217 = vmatprep.subr.bf16.mxu0 %v1216_v43  ;;  %v1314_v47 = vpop.eup %1313  ;;  %v570_v43 = vld [vmem:[%s1910_s3 + $0xa8] sm:$0xff] }
 0x2ed   :  { %1219 = vmatpush1.bf16.msra.mxu0 %v1218_v42  ;;  %v1316_v48 = vpop.eup %1315  ;;  %v569_v42 = vld [vmem:[%s1910_s3 + $0xa0] sm:$0xff] }
 0x2f0   :  { %v1318_v49 = vpop.eup %1317 }
 0x2f1   :  { %v1320_v50 = vpop.eup %1319  ;;  %v1222_v51 = vpack.c.bf16 %v1318_v49, %v1314_v47 }
 0x2f2   :  { %v1220_v52 = vpack.c.bf16 %v1320_v50, %v1316_v48 }
 0x2f4   :  { %1221 = vmatprep.subr.bf16.mxu0 %v1220_v52  ;;  %v572_v52 = vld [vmem:[%s1910_s3 + $0xb8] sm:$0xff] }
 0x2f5   :  { %1223 = vmatpush1.bf16.msra.mxu0 %v1222_v51  ;;  %v571_v51 = vld [vmem:[%s1910_s3 + $0xb0] sm:$0xff] }
 0x2f8   :  { %1161 = vmatmul.mubr.msk.f32.vlgmr.msra.gmra.mrb[16].mxu0 %vm220_vm1, %v1552_v44 }
 0x2f9   :  { %645 = vmatprep.mubr.f32.mxu0 %v1385_v3 }
 0x3cb   :  { %v533_v53 = vpop.f32.mrb[16].mxu0 }
 0x3cc   :  { %v534_v54 = vadd.f32 %v533_v53, %v1560_v45  ;;  %v535_v55 = vpop.f32.mrb[17].mxu0 }
 0x3cd   :  { %v536_v56 = vadd.f32 %v535_v55, %v1565_v46 }
 0x3ce   :  { %v540_v58 = vmul.f32 0.083489224, %v534_v54 }
 0x3cf   :  { %v541_v61 = vmul.f32 0.083489224, %v536_v56 }
 0x3d0   :  { %v542_v63 = vsub.f32 %v538_v57, %v540_v58  ;;  %v573_v57 = vld [vmem:[%s1910_s3 + $0xc0] sm:$0xff] }
 0x3d1   :  { %v543_v0 = vsub.f32 %v539_v60, %v541_v61 }
 0x3d2   :  { %v1162_v5 = vclamps-f32 %v542_v63, 1.0 }
 0x3d3   :  { %v1163_v10 = vclamps-f32 %v543_v0, 1.0 }
 0x3d4   :  { %v548_v12 = vmul.f32 0.41068545, %v1162_v5  ;;  %v575_v5 = vld [vmem:[%s1910_s3 + $0xd0] sm:$0xff] }
 0x3d5   :  { %v549_v25 = vmul.f32 0.41068545, %v1163_v10 }
 0x3d6   :  { %v552_v27 = vadd.f32 %v550_v11, %v548_v12 }
 0x3d7   :  { %v553_v29 = vadd.f32 %v551_v24, %v549_v25 }
 0x3d8   :  { %v1699_v31 = vsel %vm40_vm3, %v552_v27, %v561_v28  ;;  %v578_v28 = vld [vmem:[%s1910_s3 + $0xe8] sm:$0xff] }
 0x3d9   :  { %v1694_v30 = vsel %vm41_vm2, %v553_v29, %v562_v26  ;;  %v577_v26 = vld [vmem:[%s1910_s3 + $0xe0] sm:$0xff] }
 0x3da   :  { %581 = vmatprep.subr.mxu0 %v1694_v30 }
 0x3db   :  { %582 = vmatpush1.msra.mxu0 %v1699_v31 }
 0x3dc   :  { %1166 = vmatmul.mubr.msk.f32.vlgmr.msra.gmra.mrb[18].mxu0 %vm66_vm0, %v1438_v15 }
 0x3dd   :  { %651 = vmatprep.mubr.f32.mxu0 %v1385_v3 }
 0x3e0   :  { %1167 = vmatmul.mubr.msk.f32.gmra.mrb[20].mxu0 %vm66_vm0, %v1448_v16 }
 0x3e1   :  { %657 = vmatprep.mubr.f32.mxu0 %v1385_v3 }
 0x3e4   :  { %1168 = vmatmul.mubr.msk.f32.gmra.mrb[22].mxu0 %vm66_vm0, %v1456_v17 }
 0x3e5   :  { %663 = vmatprep.mubr.f32.mxu0 %v1385_v3 }
 0x3e8   :  { %1169 = vmatmul.mubr.msk.f32.gmra.mrb[24].mxu0 %vm66_vm0, %v1464_v18 }
 0x3e9   :  { %669 = vmatprep.mubr.f32.mxu0 %v1385_v3 }
 0x3ec   :  { %1170 = vmatmul.mubr.msk.f32.gmra.mrb[26].mxu0 %vm66_vm0, %v1472_v19 }
 0x3ed   :  { %675 = vmatprep.mubr.f32.mxu0 %v1385_v3 }
 0x3f0   :  { %1171 = vmatmul.mubr.msk.f32.gmra.mrb[28].mxu0 %vm66_vm0, %v1480_v20 }
 0x3f1   :  { %681 = vmatprep.mubr.f32.mxu0 %v1385_v3 }
 0x3f4   :  { %1172 = vmatmul.mubr.msk.f32.gmra.mrb[30].mxu0 %vm66_vm0, %v1488_v21 }
 0x3f5   :  { %687 = vmatprep.mubr.f32.mxu0 %v1385_v3 }
 0x3f8   :  { %1173 = vmatmul.mubr.msk.f32.gmra.mrb[32].mxu0 %vm66_vm0, %v1496_v22 }
 0x3f9   :  { %1017 = vmatprep.mubr.f32.mxu0 %v1385_v3 }
 0x4af   :  { %v647_v32 = vpop.f32.mrb[18].mxu0 }
 0x4b0   :  { %v648_v33 = vadd.f32 %v647_v32, %v565_v13  ;;  %v649_v34 = vpop.f32.mrb[19].mxu0 }
 0x4b1   :  { %v650_v35 = vadd.f32 %v649_v34, %v566_v23 }
 0x4b2   :  { %1321 = vtanh.f32 %v648_v33 }
 0x4b3   :  { %v653_v38 = vpop.f32.mrb[20].mxu0  ;;  %1323 = vtanh.f32 %v650_v35 }
 0x4b4   :  { %v654_v39 = vadd.f32 %v653_v38, %v567_v36  ;;  %v655_v40 = vpop.f32.mrb[21].mxu0  ;;  %v579_v36 = vld [vmem:[%s1910_s3 + $0xf0] sm:$0xff]  ;;  %v580_v38 = vld [vmem:[%s1910_s3 + $0xf8] sm:$0xff] }
 0x4b5   :  { %v656_v41 = vadd.f32 %v655_v40, %v568_v37 }
 0x4b6   :  { %1325 = vtanh.f32 %v654_v39 }
 0x4b7   :  { %1327 = vtanh.f32 %v656_v41  ;;  %v659_v47 = vpop.f32.mrb[22].mxu0 }
 0x4b8   :  { %v660_v48 = vadd.f32 %v659_v47, %v569_v42  ;;  %v661_v49 = vpop.f32.mrb[23].mxu0 }
 0x4b9   :  { %v662_v50 = vadd.f32 %v661_v49, %v570_v43 }
 0x4ba   :  { %1329 = vtanh.f32 %v660_v48 }
 0x4bb   :  { %v665_v53 = vpop.f32.mrb[24].mxu0  ;;  %1331 = vtanh.f32 %v662_v50 }
 0x4bc   :  { %v666_v54 = vadd.f32 %v665_v53, %v571_v51  ;;  %v667_v55 = vpop.f32.mrb[25].mxu0  ;;  %v1322_v58 = vpop.eup %1321 }
 0x4bd   :  { %v668_v56 = vadd.f32 %v667_v55, %v572_v52  ;;  %v1324_v60 = vpop.eup %1323 }
 0x4be   :  { %1333 = vtanh.f32 %v666_v54 }
 0x4bf   :  { %1335 = vtanh.f32 %v668_v56  ;;  %v671_v61 = vpop.f32.mrb[26].mxu0 }
 0x4c0   :  { %v1326_v62 = vpop.eup %1325  ;;  %v672_v63 = vadd.f32 %v671_v61, %v573_v57  ;;  %v673_v0 = vpop.f32.mrb[27].mxu0 }
 0x4c1   :  { %v1328_v1 = vpop.eup %1327  ;;  %v674_v2 = vadd.f32 %v673_v0, %v574_v59  ;;  %v1226_v6 = vpack.c.bf16 %v1326_v62, %v1322_v58 }
 0x4c2   :  { %v1224_v10 = vpack.c.bf16 %v1328_v1, %v1324_v60  ;;  %1337 = vtanh.f32 %v672_v63  ;;  %v781_v63 = vmul.f32 1.0012076, %v1699_v31  ;;  %v1178_v1 = vld [vmem:[%s1909_s2 + $0x38] sm:$0xff] }
 0x4c3   :  { %v677_v11 = vpop.f32.mrb[28].mxu0  ;;  %1339 = vtanh.f32 %v674_v2  ;;  %v782_v2 = vmul.f32 1.0012076, %v1694_v30 }
 0x4c4   :  { %v678_v12 = vadd.f32 %v677_v11, %v575_v5  ;;  %v679_v24 = vpop.f32.mrb[29].mxu0  ;;  %1225 = vmatprep.subr.bf16.mxu1 %v1224_v10  ;;  %v1330_v27 = vpop.eup %1329  ;;  %v798_v11 = vmul.f32 0.99995, %v1425_v7 }
 0x4c5   :  { %v680_v25 = vadd.f32 %v679_v24, %v576_v8  ;;  %1227 = vmatpush1.bf16.msra.mxu1 %v1226_v6  ;;  %v1332_v29 = vpop.eup %1331  ;;  %v1177_v6 = vld [vmem:[%s1909_s2 + $0x30] sm:$0xff] }
 0x4c6   :  { %1341 = vtanh.f32 %v678_v12  ;;  %v803_v12 = vmul.f32 0.01, %v1178_v1  ;;  %v818_v1 = vld [vmem:[%s1910_s3 + $0x50] sm:$0xff] }
 0x4c7   :  { %1343 = vtanh.f32 %v680_v25  ;;  %v683_v13 = vpop.f32.mrb[30].mxu0  ;;  %v797_v25 = vmul.f32 0.99995, %v1427_v9 }
 0x4c8   :  { %v1334_v23 = vpop.eup %1333  ;;  %v684_v32 = vadd.f32 %v683_v13, %v577_v26  ;;  %v685_v33 = vpop.f32.mrb[31].mxu0  ;;  %v802_v26 = vmul.f32 0.01, %v1177_v6  ;;  %v794_v13 = vmul.f32 0.20366304, %v1694_v30 }
 0x4c9   :  { %v1336_v34 = vpop.eup %1335  ;;  %v686_v35 = vadd.f32 %v685_v33, %v578_v28  ;;  %v1230_v37 = vpack.c.bf16 %v1334_v23, %v1330_v27  ;;  %v793_v28 = vmul.f32 0.20366304, %v1699_v31 }
 0x4ca   :  { %v1228_v39 = vpack.c.bf16 %v1336_v34, %v1332_v29  ;;  %1345 = vtanh.f32 %v684_v32  ;;  %v805_v32 = vadd.f32 %v803_v12, %v798_v11  ;;  %v804_v34 = vadd.f32 %v802_v26, %v797_v25  ;;  %v821_v26 = vld [vmem:[%s1910_s3 + $0x68] sm:$0xff] }
 0x4cb   :  { %v689_v40 = vpop.f32.mrb[32].mxu0  ;;  %1347 = vtanh.f32 %v686_v35 }
 0x4cc   :  { %v690_v41 = vadd.f32 %v689_v40, %v579_v36  ;;  %v691_v42 = vpop.f32.mrb[33].mxu0  ;;  %1229 = vmatprep.subr.bf16.mxu1 %v1228_v39  ;;  %v1338_v47 = vpop.eup %1337  ;;  %v812_v40 = vld [vmem:[%s1910_s3 + $0x20] sm:$0xff] }
 0x4cd   :  { %v692_v43 = vadd.f32 %v691_v42, %v580_v38  ;;  %1231 = vmatpush1.bf16.msra.mxu1 %v1230_v37  ;;  %v1340_v48 = vpop.eup %1339 }
 0x4ce   :  { %1349 = vtanh.f32 %v690_v41  ;;  %v813_v41 = vld [vmem:[%s1910_s3 + $0x28] sm:$0xff] }
 0x4cf   :  { %1351 = vtanh.f32 %v692_v43 }
 0x4d0   :  { %v1342_v49 = vpop.eup %1341 }
 0x4d1   :  { %v1344_v50 = vpop.eup %1343  ;;  %v1234_v51 = vpack.c.bf16 %v1342_v49, %v1338_v47  ;;  %v814_v49 = vld [vmem:[%s1910_s3 + $0x30] sm:$0xff] }
 0x4d2   :  { %v1232_v52 = vpack.c.bf16 %v1344_v50, %v1340_v48  ;;  %v815_v50 = vld [vmem:[%s1910_s3 + $0x38] sm:$0xff] }
 0x4d4   :  { %1233 = vmatprep.subr.bf16.mxu1 %v1232_v52  ;;  %v1346_v53 = vpop.eup %1345 }
 0x4d5   :  { %1235 = vmatpush1.bf16.msra.mxu1 %v1234_v51  ;;  %v1348_v54 = vpop.eup %1347 }
 0x4d8   :  { %v1350_v55 = vpop.eup %1349 }
 0x4d9   :  { %v1352_v56 = vpop.eup %1351  ;;  %v1238_v57 = vpack.c.bf16 %v1350_v55, %v1346_v53  ;;  %v816_v55 = vld [vmem:[%s1910_s3 + $0x40] sm:$0xff] }
 0x4da   :  { %v1236_v58 = vpack.c.bf16 %v1352_v56, %v1348_v54 }
 0x4dc   :  { %1237 = vmatprep.subr.bf16.mxu1 %v1236_v58 }
 0x4dd   :  { %1239 = vmatpush1.bf16.msra.mxu1 %v1238_v57  ;;  %v817_v57 = vld [vmem:[%s1910_s3 + $0x48] sm:$0xff] }
 0x4e0   :  { %1174 = vmatmul.mubr.msk.f32.vlgmr.msra.gmra.mrb[18].mxu1 %vm220_vm1, %v1552_v44 }
 0x4e1   :  { %888 = vmatprep.mubr.f32.mxu1 %v1385_v3 }
 0x5b3   :  { %v776_v59 = vpop.f32.mrb[18].mxu1 }
 0x5b4   :  { %v777_v60 = vadd.f32 %v776_v59, %v1560_v45  ;;  %v778_v61 = vpop.f32.mrb[19].mxu1 }
 0x5b5   :  { %v779_v62 = vadd.f32 %v778_v61, %v1565_v46 }
 0x5b6   :  { %v783_v0 = vmul.f32 0.049160007, %v777_v60 }
 0x5b7   :  { %v784_v5 = vmul.f32 0.049160007, %v779_v62 }
 0x5b8   :  { %v785_v8 = vsub.f32 %v781_v63, %v783_v0 }
 0x5b9   :  { %v786_v10 = vsub.f32 %v782_v2, %v784_v5  ;;  %v819_v5 = vld [vmem:[%s1910_s3 + $0x58] sm:$0xff] }
 0x5ba   :  { %v1175_v24 = vclamps-f32 %v785_v8, 1.0 }
 0x5bb   :  { %v1176_v27 = vclamps-f32 %v786_v10, 1.0 }
 0x5bc   :  { %v791_v29 = vmul.f32 0.79653263, %v1175_v24  ;;  %v820_v24 = vld [vmem:[%s1910_s3 + $0x60] sm:$0xff] }
 0x5bd   :  { %v792_v23 = vmul.f32 0.79653263, %v1176_v27 }
 0x5be   :  { %v795_v33 = vadd.f32 %v793_v28, %v791_v29 }
 0x5bf   :  { %v796_v35 = vadd.f32 %v794_v13, %v792_v23 }
 0x5c0   :  { %v1798_v37 = vsel %vm40_vm3, %v795_v33, %v804_v34  ;;  %v822_v34 = vld [vmem:[%s1910_s3 + $0x70] sm:$0xff] }
 0x5c1   :  { %v1793_v36 = vsel %vm41_vm2, %v796_v35, %v805_v32 }
 0x5c2   :  { %824 = vmatprep.subr.mxu1 %v1793_v36 }
 0x5c3   :  { %825 = vmatpush1.msra.mxu1 %v1798_v37 }
 0x5c4   :  { %1179 = vmatmul.mubr.msk.f32.vlgmr.msra.gmra.mrb[20].mxu1 %vm66_vm0, %v1438_v15  ;;  %v808_v15 = vld [vmem:[%s1910_s3] sm:$0xff] }
 0x5c5   :  { %894 = vmatprep.mubr.f32.mxu1 %v1385_v3 }
 0x5c8   :  { %1180 = vmatmul.mubr.msk.f32.gmra.mrb[22].mxu1 %vm66_vm0, %v1448_v16  ;;  %v809_v16 = vld [vmem:[%s1910_s3 + $0x8] sm:$0xff] }
 0x5c9   :  { %900 = vmatprep.mubr.f32.mxu1 %v1385_v3 }
 0x5cc   :  { %1181 = vmatmul.mubr.msk.f32.gmra.mrb[24].mxu1 %vm66_vm0, %v1456_v17 }
 0x5cd   :  { %906 = vmatprep.mubr.f32.mxu1 %v1385_v3 }
 0x5d0   :  { %1182 = vmatmul.mubr.msk.f32.gmra.mrb[26].mxu1 %vm66_vm0, %v1464_v18 }
 0x5d1   :  { %912 = vmatprep.mubr.f32.mxu1 %v1385_v3 }
 0x5d4   :  { %1183 = vmatmul.mubr.msk.f32.gmra.mrb[28].mxu1 %vm66_vm0, %v1472_v19 }
 0x5d5   :  { %918 = vmatprep.mubr.f32.mxu1 %v1385_v3 }
 0x5d8   :  { %1184 = vmatmul.mubr.msk.f32.gmra.mrb[30].mxu1 %vm66_vm0, %v1480_v20 }
 0x5d9   :  { %924 = vmatprep.mubr.f32.mxu1 %v1385_v3 }
 0x5dc   :  { %1185 = vmatmul.mubr.msk.f32.gmra.mrb[32].mxu1 %vm66_vm0, %v1488_v21  ;;  %v810_v21 = vld [vmem:[%s1910_s3 + $0x10] sm:$0xff] }
 0x5dd   :  { %930 = vmatprep.mubr.f32.mxu1 %v1385_v3 }
 0x5e0   :  { %1186 = vmatmul.mubr.msk.f32.gmra.mrb[34].mxu1 %vm66_vm0, %v1496_v22  ;;  %v811_v22 = vld [vmem:[%s1910_s3 + $0x18] sm:$0xff] }
 0x697   :  { %v890_v17 = vpop.f32.mrb[20].mxu1 }
 0x698   :  { %v891_v18 = vadd.f32 %v890_v17, %v808_v15  ;;  %v892_v19 = vpop.f32.mrb[21].mxu1  ;;  %v823_v15 = vld [vmem:[%s1910_s3 + $0x78] sm:$0xff] }
 0x699   :  { %v893_v20 = vadd.f32 %v892_v19, %v809_v16 }
 0x69a   :  { %1353 = vtanh.f32 %v891_v18 }
 0x69b   :  { %v896_v30 = vpop.f32.mrb[22].mxu1  ;;  %1355 = vtanh.f32 %v893_v20 }
 0x69c   :  { %v897_v31 = vadd.f32 %v896_v30, %v810_v21  ;;  %v898_v38 = vpop.f32.mrb[23].mxu1 }
 0x69d   :  { %v899_v39 = vadd.f32 %v898_v38, %v811_v22 }
 0x69e   :  { %1357 = vtanh.f32 %v897_v31 }
 0x69f   :  { %1359 = vtanh.f32 %v899_v39  ;;  %v902_v42 = vpop.f32.mrb[24].mxu1 }
 0x6a0   :  { %v903_v43 = vadd.f32 %v902_v42, %v812_v40  ;;  %v904_v47 = vpop.f32.mrb[25].mxu1 }
 0x6a1   :  { %v905_v48 = vadd.f32 %v904_v47, %v813_v41 }
 0x6a2   :  { %1361 = vtanh.f32 %v903_v43 }
 0x6a3   :  { %v908_v51 = vpop.f32.mrb[26].mxu1  ;;  %1363 = vtanh.f32 %v905_v48 }
 0x6a4   :  { %v909_v52 = vadd.f32 %v908_v51, %v814_v49  ;;  %v910_v53 = vpop.f32.mrb[27].mxu1  ;;  %v1354_v56 = vpop.eup %1353 }
 0x6a5   :  { %v911_v54 = vadd.f32 %v910_v53, %v815_v50  ;;  %v1356_v58 = vpop.eup %1355  ;;  %v1024_v53 = vmul.f32 1.00005, %v1798_v37 }
 0x6a6   :  { %1365 = vtanh.f32 %v909_v52 }
 0x6a7   :  { %1367 = vtanh.f32 %v911_v54  ;;  %v914_v59 = vpop.f32.mrb[28].mxu1 }
 0x6a8   :  { %v1358_v60 = vpop.eup %1357  ;;  %v915_v61 = vadd.f32 %v914_v59, %v816_v55  ;;  %v916_v62 = vpop.f32.mrb[29].mxu1  ;;  %v1025_v55 = vmul.f32 1.00005, %v1793_v36  ;;  %v1034_v59 = vmul.f32 0.0, %v1798_v37 }
 0x6a9   :  { %v1360_v63 = vpop.eup %1359  ;;  %v917_v0 = vadd.f32 %v916_v62, %v817_v57  ;;  %v1242_v2 = vpack.c.bf16 %v1358_v60, %v1354_v56 }
 0x6aa   :  { %v1240_v6 = vpack.c.bf16 %v1360_v63, %v1356_v58  ;;  %1369 = vtanh.f32 %v915_v61 }
 0x6ab   :  { %v920_v8 = vpop.f32.mrb[30].mxu1  ;;  %1371 = vtanh.f32 %v917_v0 }
 0x6ac   :  { %v921_v10 = vadd.f32 %v920_v8, %v818_v1  ;;  %v922_v11 = vpop.f32.mrb[31].mxu1  ;;  %1241 = vmatprep.subr.bf16.mxu0 %v1240_v6  ;;  %v1362_v25 = vpop.eup %1361  ;;  %v31_v6 = vld [vmem:[%s1910_s3 + $0x2d0] sm:$0xff] }
 0x6ad   :  { %v923_v12 = vadd.f32 %v922_v11, %v819_v5  ;;  %1243 = vmatpush1.bf16.msra.mxu0 %v1242_v2  ;;  %v1364_v27 = vpop.eup %1363 }
 0x6ae   :  { %1373 = vtanh.f32 %v921_v10 }
 0x6af   :  { %1375 = vtanh.f32 %v923_v12  ;;  %v926_v28 = vpop.f32.mrb[32].mxu1 }
 0x6b0   :  { %v1366_v29 = vpop.eup %1365  ;;  %v927_v13 = vadd.f32 %v926_v28, %v820_v24  ;;  %v928_v23 = vpop.f32.mrb[33].mxu1 }
 0x6b1   :  { %v1368_v32 = vpop.eup %1367  ;;  %v929_v33 = vadd.f32 %v928_v23, %v821_v26  ;;  %v1246_v35 = vpack.c.bf16 %v1366_v29, %v1362_v25 }
 0x6b2   :  { %v1244_v16 = vpack.c.bf16 %v1368_v32, %v1364_v27  ;;  %1377 = vtanh.f32 %v927_v13 }
 0x6b3   :  { %v932_v17 = vpop.f32.mrb[34].mxu1  ;;  %1379 = vtanh.f32 %v929_v33 }
 0x6b4   :  { %v933_v18 = vadd.f32 %v932_v17, %v822_v34  ;;  %v934_v19 = vpop.f32.mrb[35].mxu1  ;;  %1245 = vmatprep.subr.bf16.mxu0 %v1244_v16  ;;  %v1370_v21 = vpop.eup %1369 }
 0x6b5   :  { %v935_v20 = vadd.f32 %v934_v19, %v823_v15  ;;  %1247 = vmatpush1.bf16.msra.mxu0 %v1246_v35  ;;  %v1372_v22 = vpop.eup %1371 }
 0x6b6   :  { %1381 = vtanh.f32 %v933_v18 }
 0x6b7   :  { %1383 = vtanh.f32 %v935_v20 }
 0x6b8   :  { %v1374_v30 = vpop.eup %1373 }
 0x6b9   :  { %v1376_v31 = vpop.eup %1375  ;;  %v1250_v38 = vpack.c.bf16 %v1374_v30, %v1370_v21 }
 0x6ba   :  { %v1248_v39 = vpack.c.bf16 %v1376_v31, %v1372_v22 }
 0x6bc   :  { %1249 = vmatprep.subr.bf16.mxu0 %v1248_v39  ;;  %v1378_v40 = vpop.eup %1377 }
 0x6bd   :  { %1251 = vmatpush1.bf16.msra.mxu0 %v1250_v38  ;;  %v1380_v41 = vpop.eup %1379 }
 0x6c0   :  { %v1382_v42 = vpop.eup %1381 }
 0x6c1   :  { %v1384_v43 = vpop.eup %1383  ;;  %v1254_v47 = vpack.c.bf16 %v1382_v42, %v1378_v40 }
 0x6c2   :  { %v1252_v48 = vpack.c.bf16 %v1384_v43, %v1380_v41 }
 0x6c4   :  { %1253 = vmatprep.subr.bf16.mxu0 %v1252_v48 }
 0x6c5   :  { %1255 = vmatpush1.bf16.msra.mxu0 %v1254_v47 }
 0x6c8   :  { %1187 = vmatmul.mubr.msk.f32.vlgmr.msra.gmra.mrb[34].mxu0 %vm220_vm1, %v1552_v44  ;;  %v1035_v44 = vmul.f32 0.0, %v1793_v36  ;;  %v29_v36 = vld [vmem:[%s1910_s3 + $0x2b0] sm:$0xff] }
 0x6c9   :  { %1110 = vmatprep.mubr.f32.mxu0 %v1385_v3 }
 0x79b   :  { %v1019_v49 = vpop.f32.mrb[34].mxu0 }
 0x79c   :  { %v1020_v50 = vadd.f32 %v1019_v49, %v1560_v45  ;;  %v1021_v51 = vpop.f32.mrb[35].mxu0 }
 0x79d   :  { %v1022_v52 = vadd.f32 %v1021_v51, %v1565_v46  ;;  %v28_v46 = vld [vmem:[%s1910_s3 + $0x2a0] sm:$0xff] }
 0x79e   :  { %v1026_v54 = vmul.f32 0.0100005, %v1020_v50 }
 0x79f   :  { %v1027_v56 = vmul.f32 0.0100005, %v1022_v52 }
 0x7a0   :  { %v1028_v57 = vsub.f32 %v1024_v53, %v1026_v54 }
 0x7a1   :  { %v1029_v58 = vsub.f32 %v1025_v55, %v1027_v56 }
 0x7a2   :  { %v1188_v60 = vclamps-f32 %v1028_v57, 1.0 }
 0x7a3   :  { %v1189_v61 = vclamps-f32 %v1029_v58, 1.0 }
 0x7a4   :  { %v1036_v62 = vadd.f32 %v1188_v60, %v1034_v59 }
 0x7a5   :  { %v1037_v63 = vadd.f32 %v1189_v61, %v1035_v44 }
 0x7a6   :  { %v1038_v0 = vsel %vm40_vm3, %v1036_v62, %v1427_v9  ;;  %v30_v9 = vld [vmem:[%s1910_s3 + $0x2c0] sm:$0xff] }
 0x7a7   :  { %v1039_v45 = vsel %vm41_vm2, %v1037_v63, %v1425_v7 }
 0x7a8   :  { %1046 = vmatprep.subr.mxu0 %v1039_v45 }
 0x7a9   :  { %1047 = vmatpush1.msra.mxu0 %v1038_v0 }
 0x7aa   :  { %1190 = vmatmul.mubr.msk.f32.vlgmr.msra.gmra.mrb[36].mxu0 %vm66_vm0, %v28_v46 }
 0x7ab   :  { %1116 = vmatprep.mubr.f32.mxu0 %v1385_v3 }
 0x7ae   :  { %1191 = vmatmul.mubr.msk.f32.gmra.mrb[38].mxu0 %vm66_vm0, %v29_v36 }
 0x87d   :  { %v1112_v7 = vpop.f32.mrb[36].mxu0 }
 0x87e   :  { %v1114_v4 = vpop.f32.mrb[37].mxu0 }
 0x87f   :  { %v1123_v37 = vadd.f32 %v1114_v4, %v1112_v7 }
 0x881   :  { %1124 = vadd.xlane.f32.xlu0 %v1123_v37  ;;  %v1118_v1 = vpop.f32.mrb[38].mxu0 }
 0x882   :  { %v1120_v2 = vpop.f32.mrb[39].mxu0 }
 0x883   :  { %v1126_v5 = vadd.f32 %v1120_v2, %v1118_v1 }
 0x885   :  { %1127 = vadd.xlane.f32.xlu0 %v1126_v5 }
 0x90e   :  { %v1125_v3 = vpop.xlane.xlu0 %1124 }
 0x90f   :  { %v1129_v14 = vadd.f32 %v1125_v3, %v30_v9 }
 0x911   :  { %1132 = vst.msk [vmem:[%s1912_s4] sm:$0xff] %vm1131_vm4, %v1129_v14 }
 0x912   :  { %v1128_v8 = vpop.xlane.xlu0 %1127 }
 0x913   :  { %v1130_v10 = vadd.f32 %v1128_v8, %v31_v6 }
 0x915   :  { %1133 = vst.msk [vmem:[%s1912_s4 + $0x8] sm:$0xff] %vm1131_vm4, %v1130_v10 }

</bundles_post_ra>
